<compile_context>
chip_gen: v7x
topology: tpu7x:2x2x1
jax: 0.10.0
libtpu: 0.0.40
codegen_flags: <defaults>
</compile_context>

<pallas_src>
import jax
import jax.numpy as jnp
from jax import lax
from jax.experimental import pallas as pl
from jax.experimental.pallas import tpu as pltpu

EPS = 1e-5


def convblock_kernel(x_ref, w_ref, gb_ref, o_ref):
    # x_ref:  (N, Cin, L)        bf16  full input, identical for every grid step
    # w_ref:  (K, Cb, Cin)       bf16  conv weight block, tap-major
    # gb_ref: (2, 1, Cb, 1)      f32   [gamma; beta]
    # o_ref:  (N, Cb, Lout)      f32   output block in the module's native layout
    N, Cin, _ = x_ref.shape
    K = w_ref.shape[0]
    Cb = o_ref.shape[1]
    Lout = o_ref.shape[2]
    inv_count = 1.0 / float(N * Lout)

    # ---- Conv1d: K shifted-window batched MXU dots, f32 accumulation staged in o_ref ----
    o_ref[...] = jnp.zeros_like(o_ref)
    for k in range(K):  # K is small and static -> unrolled
        wk = jnp.broadcast_to(w_ref[k][None], (N, Cb, Cin))   # bf16 (N, Cb, Cin)
        xk = x_ref[:, :, k:k + Lout]                           # bf16 (N, Cin, Lout)
        o_ref[...] += jnp.einsum("noc,ncl->nol", wk, xk,
                                 preferred_element_type=jnp.float32)

    y = o_ref[...]                                             # f32 conv output (no bias)

    # ---- BatchNorm1d (training-mode batch stats) fused epilogue ----
    s = jnp.sum(y, axis=(0, 2), keepdims=True)                 # (1, Cb, 1)
    ss = jnp.sum(y * y, axis=(0, 2), keepdims=True)            # (1, Cb, 1)
    mean = s * inv_count
    var = ss * inv_count - mean * mean                         # biased variance
    gamma = gb_ref[0]                                          # (1, Cb, 1)
    beta = gb_ref[1]                                           # (1, Cb, 1)
    scale = gamma * lax.rsqrt(var + EPS)                       # EUP rsqrt (free slot)
    shift = beta - mean * scale

    # ---- affine + ReLU, in-place overwrite of the staged conv result ----
    o_ref[...] = jnp.maximum(y * scale + shift, 0.0)


def convblock_forward(x, weight, bias, gamma, beta):
    """x: (N, Cin, L); weight: (Cout, Cin, K); bias/gamma/beta: (Cout,)."""
    N, Cin, L = x.shape
    Cout, _, K = weight.shape
    Lout = L - K + 1

    # Conv bias is cancelled exactly by the train-mode BN mean subtraction.
    del bias

    # Channel-block grid: each block is fully independent (per-channel BN stats).
    # TODO(synk): on v7x pick c_block = min(128, Cout // 2) when Cout >= 256 so both
    # TensorCores get work; irrelevant at these toy sizes (grid = 1).
    c_block = min(Cout, 128)
    n_blocks = pl.cdiv(Cout, c_block)
    Cpad = n_blocks * c_block
    if Cpad != Cout:  # zero-padded channel tail: padded channels produce exact zeros
        pad = Cpad - Cout
        weight = jnp.pad(weight, ((0, pad), (0, 0), (0, 0)))
        gamma = jnp.pad(gamma, (0, pad))
        beta = jnp.pad(beta, (0, pad))

    # Cheap wrapper-side layout only on the tiny arrays; x keeps its native layout.
    xb = x.astype(jnp.bfloat16)                                    # (N, Cin, L)
    wk = jnp.transpose(weight, (2, 0, 1)).astype(jnp.bfloat16)     # (K, Cpad, Cin)
    gb = jnp.stack([gamma, beta]).reshape(2, 1, Cpad, 1).astype(jnp.float32)

    out = pl.pallas_call(
        convblock_kernel,
        out_shape=jax.ShapeDtypeStruct((N, Cpad, Lout), jnp.float32),
        grid=(n_blocks,),
        in_specs=[
            # x is identical for every channel block -> single buffer, one DMA.
            pl.BlockSpec((N, Cin, L), lambda i: (0, 0, 0),
                         pipeline_mode=pl.Buffered(1)),
            pl.BlockSpec((K, c_block, Cin), lambda i: (0, i, 0)),
            pl.BlockSpec((2, 1, c_block, 1), lambda i: (0, 0, i, 0)),
        ],
        out_specs=pl.BlockSpec((N, c_block, Lout), lambda i: (0, i, 0)),
        compiler_params=pltpu.CompilerParams(
            dimension_semantics=("parallel",),
            vmem_limit_bytes=48 * 1024 * 1024,
        ),
    )(xb, wk, gb)

    return out[:, :Cout, :] if Cpad != Cout else out


def reference_forward(x, weight, bias, gamma, beta):
    """Pure-JAX reference matching PyTorch ConvBlock.forward in training mode."""
    y = lax.conv_general_dilated(
        x.astype(jnp.float32), weight.astype(jnp.float32),
        window_strides=(1,), padding="VALID",
        dimension_numbers=("NCH", "OIH", "NCH"),
    ) + bias.reshape(1, -1, 1)
    mean = jnp.mean(y, axis=(0, 2), keepdims=True)
    var = jnp.mean((y - mean) ** 2, axis=(0, 2), keepdims=True)
    y = (y - mean) / jnp.sqrt(var + EPS)
    y = y * gamma.reshape(1, -1, 1) + beta.reshape(1, -1, 1)
    return jnp.maximum(y, 0.0)


if __name__ == "__main__":
    # Small shapes consistent with Conv1d(in_channels=4, out_channels=8, kernel_size=3).
    N, Cin, Cout, L, K = 2, 4, 8, 16, 3

    key = jax.random.PRNGKey(0)
    kx, kw, kb, kg, kbe = jax.random.split(key, 5)
    x = jax.random.normal(kx, (N, Cin, L), dtype=jnp.float32)
    weight = jax.random.normal(kw, (Cout, Cin, K), dtype=jnp.float32) * 0.1
    bias = jax.random.normal(kb, (Cout,), dtype=jnp.float32) * 0.1
    gamma = 1.0 + 0.1 * jax.random.normal(kg, (Cout,), dtype=jnp.float32)
    beta = 0.1 * jax.random.normal(kbe, (Cout,), dtype=jnp.float32)

    out = jax.block_until_ready(convblock_forward(x, weight, bias, gamma, beta))
    assert out.shape == (N, Cout, L - K + 1)

    # Tight check: reference on bf16-quantized matmul operands (f32 accumulation, f32 BN)
    # -- validates the kernel logic bit-for-bit up to f32 rounding.
    ref_q = jax.block_until_ready(reference_forward(
        x.astype(jnp.bfloat16).astype(jnp.float32),
        weight.astype(jnp.bfloat16).astype(jnp.float32), bias, gamma, beta))
    assert jnp.allclose(out, ref_q, atol=1e-4, rtol=1e-4), "mismatch vs quantized-input reference"

    # End-to-end check vs the full-f32 module semantics (bf16 operand quantization only).
    ref = jax.block_until_ready(reference_forward(x, weight, bias, gamma, beta))
    assert jnp.allclose(out, ref, atol=5e-2, rtol=5e-2), "mismatch vs f32 reference"

    print("KERNEL_OK")
</pallas_src>

<mosaic_0001>
module attributes {stable_mosaic.version = 11 : i64} {
  func.func @convblock_kernel(%arg0: i32, %arg1: memref<2x4x16xbf16, #tpu.memory_space<vmem>>, %arg2: memref<3x8x4xbf16, #tpu.memory_space<vmem>>, %arg3: memref<2x1x8x1xf32, #tpu.memory_space<vmem>>, %arg4: memref<2x8x14xf32, #tpu.memory_space<vmem>>) attributes {dimension_semantics = [#tpu.dimension_semantics<parallel>], iteration_bounds = array<i64: 1>, scalar_prefetch = 0 : i64, scratch_operands = 0 : i64, tpu.core_type = #tpu.core_type<tc>, window_params = [{pipeline_mode = #tpu.pipeline_mode<synchronous>, transform_indices = @transform_0, window_bounds = array<i64: 2, 4, 16>}, {transform_indices = @transform_1, window_bounds = array<i64: 3, 8, 4>}, {transform_indices = @transform_2, window_bounds = array<i64: 2, 1, 8, 1>}, {transform_indices = @transform_3, window_bounds = array<i64: 2, 8, 14>}]} {
    %cst = arith.constant 0.000000e+00 : f32
    %0 = vector.broadcast %cst : f32 to vector<2x8x14xf32>
    %c0 = arith.constant 0 : index
    %c0_0 = arith.constant 0 : index
    %c0_1 = arith.constant 0 : index
    %1 = vector.load %arg4[%c0, %c0_0, %c0_1] : memref<2x8x14xf32, #tpu.memory_space<vmem>>, vector<2x8x14xf32>
    tpu.vector_store %arg4[%c0, %c0_0, %c0_1], %0 {strides = array<i32>} : memref<2x8x14xf32, #tpu.memory_space<vmem>>, vector<2x8x14xf32>,
    %c0_2 = arith.constant 0 : index
    %c0_3 = arith.constant 0 : index
    %c0_4 = arith.constant 0 : index
    %2 = vector.load %arg2[%c0_2, %c0_3, %c0_4] : memref<3x8x4xbf16, #tpu.memory_space<vmem>>, vector<1x8x4xbf16>
    %3 = vector.shape_cast %2 : vector<1x8x4xbf16> to vector<8x4xbf16>
    %4 = vector.shape_cast %3 : vector<8x4xbf16> to vector<1x8x4xbf16>
    %5 = vector.shape_cast %4 : vector<1x8x4xbf16> to vector<1x8x4xbf16>
    %6 = vector.broadcast %5 : vector<1x8x4xbf16> to vector<2x8x4xbf16>
    %c0_5 = arith.constant 0 : index
    %c0_6 = arith.constant 0 : index
    %c0_7 = arith.constant 0 : index
    %7 = vector.load %arg1[%c0_5, %c0_6, %c0_7] : memref<2x4x16xbf16, #tpu.memory_space<vmem>>, vector<2x4x14xbf16>
    %c0_8 = arith.constant 0 : index
    %c0_9 = arith.constant 0 : index
    %c0_10 = arith.constant 0 : index
    %8 = vector.load %arg4[%c0_8, %c0_9, %c0_10] : memref<2x8x14xf32, #tpu.memory_space<vmem>>, vector<2x8x14xf32>
    "tpu.trace_start"() <{level = 10 : i32, message = "noc,ncl->nol"}> : () -> ()
    %cst_11 = arith.constant dense<0.000000e+00> : vector<2x8x14xf32>
    %9 = tpu.matmul %6, %7, %cst_11 {dimension_numbers = #tpu.dot_dimension_numbers<[2], [1], [1], [2], [0, 0, 0, 1, 1, 2], [0], [0]>} : vector<2x8x4xbf16>, vector<2x4x14xbf16>, vector<2x8x14xf32> -> vector<2x8x14xf32>
    "tpu.trace_stop"() : () -> ()
    %10 = arith.addf %8, %9 : vector<2x8x14xf32>
    %c0_12 = arith.constant 0 : index
    %c0_13 = arith.constant 0 : index
    %c0_14 = arith.constant 0 : index
    %11 = vector.load %arg4[%c0_12, %c0_13, %c0_14] : memref<2x8x14xf32, #tpu.memory_space<vmem>>, vector<2x8x14xf32>
    tpu.vector_store %arg4[%c0_12, %c0_13, %c0_14], %10 {strides = array<i32>} : memref<2x8x14xf32, #tpu.memory_space<vmem>>, vector<2x8x14xf32>,
    %c1 = arith.constant 1 : index
    %c0_15 = arith.constant 0 : index
    %c0_16 = arith.constant 0 : index
    %12 = vector.load %arg2[%c1, %c0_15, %c0_16] : memref<3x8x4xbf16, #tpu.memory_space<vmem>>, vector<1x8x4xbf16>
    %13 = vector.shape_cast %12 : vector<1x8x4xbf16> to vector<8x4xbf16>
    %14 = vector.shape_cast %13 : vector<8x4xbf16> to vector<1x8x4xbf16>
    %15 = vector.shape_cast %14 : vector<1x8x4xbf16> to vector<1x8x4xbf16>
    %16 = vector.broadcast %15 : vector<1x8x4xbf16> to vector<2x8x4xbf16>
    %c0_17 = arith.constant 0 : index
    %c0_18 = arith.constant 0 : index
    %c1_19 = arith.constant 1 : index
    %17 = vector.load %arg1[%c0_17, %c0_18, %c1_19] : memref<2x4x16xbf16, #tpu.memory_space<vmem>>, vector<2x4x14xbf16>
    %c0_20 = arith.constant 0 : index
    %c0_21 = arith.constant 0 : index
    %c0_22 = arith.constant 0 : index
    %18 = vector.load %arg4[%c0_20, %c0_21, %c0_22] : memref<2x8x14xf32, #tpu.memory_space<vmem>>, vector<2x8x14xf32>
    "tpu.trace_start"() <{level = 10 : i32, message = "noc,ncl->nol"}> : () -> ()
    %cst_23 = arith.constant dense<0.000000e+00> : vector<2x8x14xf32>
    %19 = tpu.matmul %16, %17, %cst_23 {dimension_numbers = #tpu.dot_dimension_numbers<[2], [1], [1], [2], [0, 0, 0, 1, 1, 2], [0], [0]>} : vector<2x8x4xbf16>, vector<2x4x14xbf16>, vector<2x8x14xf32> -> vector<2x8x14xf32>
    "tpu.trace_stop"() : () -> ()
    %20 = arith.addf %18, %19 : vector<2x8x14xf32>
    %c0_24 = arith.constant 0 : index
    %c0_25 = arith.constant 0 : index
    %c0_26 = arith.constant 0 : index
    %21 = vector.load %arg4[%c0_24, %c0_25, %c0_26] : memref<2x8x14xf32, #tpu.memory_space<vmem>>, vector<2x8x14xf32>
    tpu.vector_store %arg4[%c0_24, %c0_25, %c0_26], %20 {strides = array<i32>} : memref<2x8x14xf32, #tpu.memory_space<vmem>>, vector<2x8x14xf32>,
    %c2 = arith.constant 2 : index
    %c0_27 = arith.constant 0 : index
    %c0_28 = arith.constant 0 : index
    %22 = vector.load %arg2[%c2, %c0_27, %c0_28] : memref<3x8x4xbf16, #tpu.memory_space<vmem>>, vector<1x8x4xbf16>
    %23 = vector.shape_cast %22 : vector<1x8x4xbf16> to vector<8x4xbf16>
    %24 = vector.shape_cast %23 : vector<8x4xbf16> to vector<1x8x4xbf16>
    %25 = vector.shape_cast %24 : vector<1x8x4xbf16> to vector<1x8x4xbf16>
    %26 = vector.broadcast %25 : vector<1x8x4xbf16> to vector<2x8x4xbf16>
    %c0_29 = arith.constant 0 : index
    %c0_30 = arith.constant 0 : index
    %c2_31 = arith.constant 2 : index
    %27 = vector.load %arg1[%c0_29, %c0_30, %c2_31] : memref<2x4x16xbf16, #tpu.memory_space<vmem>>, vector<2x4x14xbf16>
    %c0_32 = arith.constant 0 : index
    %c0_33 = arith.constant 0 : index
    %c0_34 = arith.constant 0 : index
    %28 = vector.load %arg4[%c0_32, %c0_33, %c0_34] : memref<2x8x14xf32, #tpu.memory_space<vmem>>, vector<2x8x14xf32>
    "tpu.trace_start"() <{level = 10 : i32, message = "noc,ncl->nol"}> : () -> ()
    %cst_35 = arith.constant dense<0.000000e+00> : vector<2x8x14xf32>
    %29 = tpu.matmul %26, %27, %cst_35 {dimension_numbers = #tpu.dot_dimension_numbers<[2], [1], [1], [2], [0, 0, 0, 1, 1, 2], [0], [0]>} : vector<2x8x4xbf16>, vector<2x4x14xbf16>, vector<2x8x14xf32> -> vector<2x8x14xf32>
    "tpu.trace_stop"() : () -> ()
    %30 = arith.addf %28, %29 : vector<2x8x14xf32>
    %c0_36 = arith.constant 0 : index
    %c0_37 = arith.constant 0 : index
    %c0_38 = arith.constant 0 : index
    %31 = vector.load %arg4[%c0_36, %c0_37, %c0_38] : memref<2x8x14xf32, #tpu.memory_space<vmem>>, vector<2x8x14xf32>
    tpu.vector_store %arg4[%c0_36, %c0_37, %c0_38], %30 {strides = array<i32>} : memref<2x8x14xf32, #tpu.memory_space<vmem>>, vector<2x8x14xf32>,
    %c0_39 = arith.constant 0 : index
    %c0_40 = arith.constant 0 : index
    %c0_41 = arith.constant 0 : index
    %32 = vector.load %arg4[%c0_39, %c0_40, %c0_41] : memref<2x8x14xf32, #tpu.memory_space<vmem>>, vector<2x8x14xf32>
    %cst_42 = arith.constant dense<0.000000e+00> : vector<8xf32>
    %33 = vector.multi_reduction <add>, %32, %cst_42 [0, 2] : vector<2x8x14xf32> to vector<8xf32>
    %34 = vector.shape_cast %33 : vector<8xf32> to vector<1x8x1xf32>
    %35 = arith.mulf %32, %32 : vector<2x8x14xf32>
    %cst_43 = arith.constant dense<0.000000e+00> : vector<8xf32>
    %36 = vector.multi_reduction <add>, %35, %cst_43 [0, 2] : vector<2x8x14xf32> to vector<8xf32>
    %37 = vector.shape_cast %36 : vector<8xf32> to vector<1x8x1xf32>
    %cst_44 = arith.constant 0.0357142873 : f32
    %38 = vector.broadcast %cst_44 : f32 to vector<1x8x1xf32>
    %39 = arith.mulf %34, %38 : vector<1x8x1xf32>
    %cst_45 = arith.constant 0.0357142873 : f32
    %40 = vector.broadcast %cst_45 : f32 to vector<1x8x1xf32>
    %41 = arith.mulf %37, %40 : vector<1x8x1xf32>
    %42 = arith.mulf %39, %39 : vector<1x8x1xf32>
    %43 = arith.subf %41, %42 : vector<1x8x1xf32>
    %c0_46 = arith.constant 0 : index
    %c0_47 = arith.constant 0 : index
    %c0_48 = arith.constant 0 : index
    %c0_49 = arith.constant 0 : index
    %44 = vector.load %arg3[%c0_46, %c0_47, %c0_48, %c0_49] : memref<2x1x8x1xf32, #tpu.memory_space<vmem>>, vector<1x1x8x1xf32>
    %45 = vector.shape_cast %44 : vector<1x1x8x1xf32> to vector<1x8x1xf32>
    %c1_50 = arith.constant 1 : index
    %c0_51 = arith.constant 0 : index
    %c0_52 = arith.constant 0 : index
    %c0_53 = arith.constant 0 : index
    %46 = vector.load %arg3[%c1_50, %c0_51, %c0_52, %c0_53] : memref<2x1x8x1xf32, #tpu.memory_space<vmem>>, vector<1x1x8x1xf32>
    %47 = vector.shape_cast %46 : vector<1x1x8x1xf32> to vector<1x8x1xf32>
    %cst_54 = arith.constant 9.99999974E-6 : f32
    %48 = vector.broadcast %cst_54 : f32 to vector<1x8x1xf32>
    %49 = arith.addf %43, %48 : vector<1x8x1xf32>
    %50 = math.rsqrt %49 : vector<1x8x1xf32>
    %51 = arith.mulf %45, %50 : vector<1x8x1xf32>
    %52 = arith.mulf %39, %51 : vector<1x8x1xf32>
    %53 = arith.subf %47, %52 : vector<1x8x1xf32>
    %54 = vector.broadcast %51 : vector<1x8x1xf32> to vector<2x8x14xf32>
    %55 = arith.mulf %32, %54 : vector<2x8x14xf32>
    %56 = vector.broadcast %53 : vector<1x8x1xf32> to vector<2x8x14xf32>
    %57 = arith.addf %55, %56 : vector<2x8x14xf32>
    %cst_55 = arith.constant 0.000000e+00 : f32
    %58 = vector.broadcast %cst_55 : f32 to vector<2x8x14xf32>
    %59 = arith.maximumf %57, %58 : vector<2x8x14xf32>
    %c0_56 = arith.constant 0 : index
    %c0_57 = arith.constant 0 : index
    %c0_58 = arith.constant 0 : index
    %60 = vector.load %arg4[%c0_56, %c0_57, %c0_58] : memref<2x8x14xf32, #tpu.memory_space<vmem>>, vector<2x8x14xf32>
    tpu.vector_store %arg4[%c0_56, %c0_57, %c0_58], %59 {strides = array<i32>} : memref<2x8x14xf32, #tpu.memory_space<vmem>>, vector<2x8x14xf32>,
    return
  }
  func.func @transform_0(%arg0: i32) -> (i32, i32, i32) {
    %c0_i32 = arith.constant 0 : i32
    %c0_i32_0 = arith.constant 0 : i32
    %c0_i32_1 = arith.constant 0 : i32
    %c0_i32_2 = arith.constant 0 : i32
    return %c0_i32, %c0_i32_0, %c0_i32_1 : i32, i32, i32
  }
  func.func @transform_1(%arg0: i32) -> (i32, i32, i32) {
    %c0_i32 = arith.constant 0 : i32
    %c0_i32_0 = arith.constant 0 : i32
    %c0_i32_1 = arith.constant 0 : i32
    return %c0_i32, %arg0, %c0_i32_0 : i32, i32, i32
  }
  func.func @transform_2(%arg0: i32) -> (i32, i32, i32, i32) {
    %c0_i32 = arith.constant 0 : i32
    %c0_i32_0 = arith.constant 0 : i32
    %c0_i32_1 = arith.constant 0 : i32
    %c0_i32_2 = arith.constant 0 : i32
    return %c0_i32, %c0_i32_0, %arg0, %c0_i32_1 : i32, i32, i32, i32
  }
  func.func @transform_3(%arg0: i32) -> (i32, i32, i32) {
    %c0_i32 = arith.constant 0 : i32
    %c0_i32_0 = arith.constant 0 : i32
    %c0_i32_1 = arith.constant 0 : i32
    return %c0_i32, %arg0, %c0_i32_0 : i32, i32, i32
  }
}

</mosaic_0001>

<bundles_post_ra>
// kernel: tpu_custom_call.1
= control target key start
LH: loop header
LB: loop body
LE: loop exit
PB: predicated region body
PF: predicated region fallthrough
CT: control target
= control target key end

     0   :  { %s514_s14 = smov 127   ;;  %s515_s17 = smov 126   ;;  %vm28_vm0 = vcmask 1041408   ;;  %v516_v2 = vmov 0.0   ;;  %vm517_vm1 = vmmov 0   ;;  %vm24_vm2 = vcmask 31744   ;;  %s613_s0 = inlined_call_operand.vmem [shape: bf16[2,4,16], index: 0, kind: input, shape index: {}]   ;;  %s614_s1 = inlined_call_operand.vmem [shape: bf16[3,8,4], index: 1, kind: input, shape index: {}]   ;;  %s615_s2 = inlined_call_operand.vmem [shape: f32[2,1,8,1], index: 2, kind: input, shape index: {}]   ;;  %s616_s3 = inlined_call_operand.hbm [shape: f32[2,8,14], index: 3, kind: output, shape index: {}]  }
   0x1   :  { %v420_v0 = vld.sshfl [vmem:[%s613_s0] sm:$0x3 pattern:$0x76325410]  ;;  %442 = vmatprep.subr.bf16.mxu0 %v516_v2  ;;  %448 = vmatprep.subr.bf16.mxu1 %v516_v2  ;;  %v21_v4 = vld [vmem:[%s613_s0 + $0x2] sm:$0x3] }
   0x2   :  { %133 = vrot.lane.b32.xlu0 %v420_v0, %s514_s14  ;;  %v422_v1 = vld.sshfl [vmem:[%s613_s0 + $0x2] sm:$0x3 pattern:$0x76325410]  ;;  %252 = vrot.lane.b32.xlu1 %v420_v0, %s515_s17  ;;  %v20_v3 = vld [vmem:[%s613_s0] sm:$0x3] }
   0x3   :  { %v30_v5 = vsel %vm28_vm0, %v20_v3, 0  ;;  %v73_v6 = vsel %vm28_vm0, %v21_v4, 0  ;;  %444 = vmatprep.mubr.msk.bf16.mxu0 %vm517_vm1, %v516_v2  ;;  %450 = vmatprep.mubr.msk.bf16.mxu1 %vm517_vm1, %v516_v2  ;;  %v19_v7 = vld [vmem:[%s614_s1] sm:$0xf]  ;;  %vm16_vm3 = vcmask 113664  }
   0x4   :  { %443 = vmatpush3.bf16.msra.mxu0 %v30_v5  ;;  %449 = vmatpush3.bf16.msra.mxu1 %v73_v6 }
   0x5   :  { %8 = vsyncpa [#allocation3], 0  ;;  %17 = vst.msk [vmem:[#allocation2] sm:$0xff] %vm16_vm3, %v516_v2  ;;  %454 = vmatprep.subr.bf16.mxu0 %v516_v2  ;;  %460 = vmatprep.subr.bf16.mxu1 %v516_v2  ;;  %v419_v11 = vld [vmem:[%s614_s1 + $0x4] sm:$0xf]  ;;  %v518_v0 = vmov 0  }
   0x6   :  { %189 = vrot.lane.b32.xlu0 %v422_v1, %s514_s14  ;;  %308 = vrot.lane.b32.xlu1 %v422_v1, %s515_s17  ;;  %18 = vst.msk [vmem:[#allocation2 + $0x8] sm:$0xff] %vm16_vm3, %v516_v2  ;;  %v424_v17 = vld [vmem:[%s614_s1 + $0x8] sm:$0xf]  ;;  %s519_s30 = smov [#allocation2]  }
   0x7   :  { %445 = vmatmul.mubr.msk.bf16.vlgmr.msra.gmra.mrb[0].mxu0 %vm24_vm2, %v19_v7  ;;  %451 = vmatmul.mubr.msk.bf16.vlgmr.msra.gmra.mrb[0].mxu1 %vm24_vm2, %v19_v7  ;;  %s406_s4 = sshll.u32 %s519_s30, 4  ;;  %s407_s4 = int_to_ptr.vmem [resolvable:$true] %s406_s4 }
   0x8   :  { %456 = vmatprep.mubr.msk.bf16.mxu0 %vm517_vm1, %v516_v2  ;;  %462 = vmatprep.mubr.msk.bf16.mxu1 %vm517_vm1, %v516_v2  ;;  %p495_p1 = scmp.lt.s32.totalorder %s407_s4, %s407_s4 }
   0x9   :  { %486 = vset.pattern.permute.xlu0 %v518_v0  ;;  %487 = vset.pattern.permute.xlu1 %v518_v0 }
   0xc   :  { %v22_v18 = vld [vmem:[#allocation2] sm:$0xff] }
   0xd   :  { %v23_v19 = vld [vmem:[#allocation2 + $0x8] sm:$0xff] }
  0x74   :  { %v134_v8 = vpop.permute.xlu0 %133  ;;  %v253_v9 = vpop.permute.xlu1 %252 }
  0x75   :  { %v139_v10 = vsel %vm28_vm0, %v134_v8, 0  ;;  %v258_v12 = vsel %vm28_vm0, %v253_v9, 0  ;;  %v375_v8 = vld [vmem:[%s615_s2] sm:$0xff] }
  0x76   :  { %455 = vmatpush3.bf16.msra.mxu0 %v139_v10 }
  0x77   :  { %466 = vmatprep.subr.bf16.mxu0 %v516_v2 }
  0x78   :  { %v190_v13 = vpop.permute.xlu0 %189  ;;  %v309_v14 = vpop.permute.xlu1 %308 }
  0x79   :  { %v192_v15 = vsel %vm28_vm0, %v190_v13, 0  ;;  %457 = vmatmul.mubr.msk.bf16.vlgmr.msra.gmra.mrb[4].mxu0 %vm24_vm2, %v419_v11  ;;  %v311_v16 = vsel %vm28_vm0, %v309_v14, 0 }
  0x7a   :  { %461 = vmatpush3.bf16.msra.mxu1 %v192_v15  ;;  %467 = vmatpush3.bf16.msra.mxu0 %v258_v12 }
  0x7b   :  { %472 = vmatprep.subr.bf16.mxu1 %v516_v2  ;;  %468 = vmatprep.mubr.msk.bf16.mxu0 %vm517_vm1, %v516_v2 }
  0x7d   :  { %463 = vmatmul.mubr.msk.bf16.vlgmr.msra.gmra.mrb[4].mxu1 %vm24_vm2, %v419_v11  ;;  %v429_v11 = vld [vmem:[%s615_s2 + $0x8] sm:$0xff]  ;;  %s490_s2 = scalar_lea.vmem %s407_s4, 256 }
  0x7e   :  { %473 = vmatpush3.bf16.msra.mxu1 %v311_v16  ;;  %474 = vmatprep.mubr.msk.bf16.mxu1 %vm517_vm1, %v516_v2  ;;  %p491_p0 = scmp.ne.s32.totalorder %s407_s4, %s490_s2  ;;  %p496_p2 = scmp.lt.s32.totalorder %s490_s2, %s490_s2 }
  0x80   :  { %p497_p3 = por %p496_p2, %p495_p1 }
  0x81   :  { %469 = vmatmul.mubr.msk.bf16.vlgmr.msra.gmra.mrb[8].mxu0 %vm24_vm2, %v424_v17 }
  0x82   :  { %p498_p4 = pnand %p497_p3, %p491_p0 }
  0x85   :  { %475 = vmatmul.mubr.msk.bf16.vlgmr.msra.gmra.mrb[8].mxu1 %vm24_vm2, %v424_v17 }
  0xda   :  { %v66_v20 = vpop.f32.mrb[0].mxu0  ;;  %v109_v21 = vpop.f32.mrb[0].mxu1 }
  0xdb   :  { %v115_v22 = vadd.f32 %v66_v20, %v22_v18  ;;  %v116_v23 = vadd.f32 %v109_v21, %v23_v19  ;;  %v446_v24 = vpop.f32.mrb[1].mxu0  ;;  %v452_v25 = vpop.f32.mrb[1].mxu1 }
  0xdc   :  { %v69_v26 = vpop.f32.mrb[2].mxu0  ;;  %v112_v27 = vpop.f32.mrb[2].mxu1 }
  0xdd   :  { %117 = vst.msk [vmem:[#allocation2] sm:$0xff] %vm16_vm3, %v115_v22  ;;  %118 = vst.msk [vmem:[#allocation2 + $0x8] sm:$0xff] %vm16_vm3, %v116_v23  ;;  %v447_v28 = vpop.f32.mrb[3].mxu0  ;;  %v453_v29 = vpop.f32.mrb[3].mxu1 }
  0xe4   :  { %v123_v30 = vld [vmem:[#allocation2] sm:$0xff]  ;;  %v124_v34 = vld [vmem:[#allocation2 + $0x8] sm:$0xff] }
 0x14c   :  { %v175_v31 = vpop.f32.mrb[4].mxu0 }
 0x14d   :  { %v234_v32 = vadd.f32 %v175_v31, %v123_v30  ;;  %v458_v33 = vpop.f32.mrb[5].mxu0 }
 0x14e   :  { %v178_v35 = vpop.f32.mrb[6].mxu0 }
 0x14f   :  { %236 = vst.msk [vmem:[#allocation2] sm:$0xff] %vm16_vm3, %v234_v32  ;;  %v459_v36 = vpop.f32.mrb[7].mxu0 }
 0x150   :  { %v228_v37 = vpop.f32.mrb[4].mxu1 }
 0x151   :  { %v235_v38 = vadd.f32 %v228_v37, %v124_v34  ;;  %v464_v39 = vpop.f32.mrb[5].mxu1 }
 0x152   :  { %v231_v40 = vpop.f32.mrb[6].mxu1 }
 0x153   :  { %237 = vst.msk [vmem:[#allocation2 + $0x8] sm:$0xff] %vm16_vm3, %v235_v38  ;;  %v465_v41 = vpop.f32.mrb[7].mxu1 }
 0x154   :  { %v294_v42 = vpop.f32.mrb[8].mxu0 }
 0x155   :  { %v470_v43 = vpop.f32.mrb[9].mxu0 }
 0x156   :  { %v242_v44 = vld [vmem:[#allocation2] sm:$0xff]  ;;  %v297_v45 = vpop.f32.mrb[10].mxu0 }
 0x157   :  { %v353_v46 = vadd.f32 %v294_v42, %v242_v44  ;;  %v471_v47 = vpop.f32.mrb[11].mxu0 }
 0x158   :  { %v347_v48 = vpop.f32.mrb[8].mxu1 }
 0x159   :  { %355 = vst.msk [vmem:[#allocation2] sm:$0xff] %vm16_vm3, %v353_v46  ;;  %v476_v49 = vpop.f32.mrb[9].mxu1 }
 0x15a   :  { %v243_v50 = vld [vmem:[#allocation2 + $0x8] sm:$0xff]  ;;  %v350_v51 = vpop.f32.mrb[10].mxu1 }
 0x15b   :  { %v354_v52 = vadd.f32 %v347_v48, %v243_v50  ;;  %v477_v53 = vpop.f32.mrb[11].mxu1 }
 0x15d   :  { %356 = vst.msk [vmem:[#allocation2 + $0x8] sm:$0xff] %vm16_vm3, %v354_v52 }
 0x160   :  { %v357_v54 = vld [vmem:[#allocation2] sm:$0xff] }
 0x161   :  { %v364_v55 = vmul.f32 %v357_v54, %v357_v54  ;;  %v359_v56 = vsel %vm16_vm3, %v357_v54, 0.0 }
 0x163   :  { %v366_v60 = vsel %vm16_vm3, %v364_v55, 0.0 }
 0x164   :  { %v358_v57 = vld [vmem:[#allocation2 + $0x8] sm:$0xff] }
 0x165   :  { %v360_v58 = vsel %vm16_vm3, %v358_v57, 0.0  ;;  %v365_v59 = vmul.f32 %v358_v57, %v358_v57 }
 0x166   :  { %v361_v61 = vadd.f32 %v360_v58, %v359_v56 }
 0x167   :  { %v367_v62 = vsel %vm16_vm3, %v365_v59, 0.0 }
 0x168   :  { %362 = vadd.xlane.f32.xlu0 %v361_v61  ;;  %v368_v63 = vadd.f32 %v367_v62, %v366_v60 }
 0x16a   :  { %369 = vadd.xlane.f32.xlu1 %v368_v63 }
 0x1f5   :  { %v363_v1 = vpop.xlane.xlu0 %362 }
 0x1f6   :  { %v371_v2 = vmul.f32 0.035714287, %v363_v1 }
 0x1f7   :  { %v370_v3 = vpop.xlane.xlu1 %369 }
 0x1f8   :  { %v373_v4 = vmul.f32 %v371_v2, %v371_v2  ;;  %v372_v5 = vmul.f32 0.035714287, %v370_v3 }
 0x1fa   :  { %v374_v6 = vsub.f32 %v372_v5, %v373_v4 }
 0x1fc   :  { %v378_v7 = vadd.f32 1e-05, %v374_v6 }
 0x1fe   :  { %488 = vrsqrt.f32 %v378_v7 }
 0x208   :  { %v489_v9 = vpop.eup %488 }
 0x209   :  { %v380_v10 = vmul.f32 %v489_v9, %v375_v8 }
 0x20b   :  { %385 = vperm.xlu0 %486, %v380_v10   ;;  %v381_v12 = vmul.f32 %v380_v10, %v371_v2 }
 0x20d   :  { %v382_v13 = vsub.f32 %v429_v11, %v381_v12 }
 0x20f   :  { %392 = vperm.xlu1 %487, %v382_v13  }
 0x28a   :  { %v386_v14 = vpop.permute.xlu0 %385 }
 0x28b   :  { %v388_v15 = vmul.f32 %v386_v14, %v357_v54  ;;  %v389_v16 = vmul.f32 %v386_v14, %v358_v57 }
 0x28e   :  { %v393_v17 = vpop.permute.xlu1 %392 }
 0x28f   :  { %v395_v18 = vadd.f32 %v393_v17, %v388_v15  ;;  %v396_v19 = vadd.f32 %v393_v17, %v389_v16 }
 0x291   :  { %v397_v20 = vmax.f32 %v395_v18, 0.0  ;;  %v398_v21 = vmax.f32 %v396_v19, 0.0 }
 0x293   :  { %399 = vst.msk [vmem:[#allocation2] sm:$0xff] %vm16_vm3, %v397_v20  ;;  %400 = vst.msk [vmem:[#allocation2 + $0x8] sm:$0xff] %vm16_vm3, %v398_v21 }
 0x294   :  { %501 = shalt.err (!%p498_p4)
}
 0x295   :  { %s502_s7 = scalar_lea.hbm %s616_s3, 256 }
 0x296   :  { %p503_p5 = scmp.ne.s32.totalorder %s616_s3, %s502_s7  ;;  %p506_p6 = scmp.lt.u32.totalorder %s502_s7, %s616_s3 }
 0x298   :  { %p508_p7 = pnand %p506_p6, %p503_p5 }
 0x29a   :  { %511 = shalt.err (!%p508_p7)
}
 0x29b   :  { %s520_s12 = smov 128   ;;  %s521_s13 = smov 8  }
 0x29c   :  { %412 = dma.vmem_to_hbm [thread:$0]  %s407_s4, 256, %s616_s3, [#allocation3], %s520_s12, %s520_s12, %s521_s13  }
 0x29d   :  { %512 = dma.done.wait [#allocation3], 256  }
 0x29e   :  { %513 = vsyncadd [#allocation3], 4294967040 }
 0x29f   :  { %416 = vsyncpa [#allocation3], 1 }

</bundles_post_ra>
